<compile_context>
chip_gen: v7x
topology: tpu7x:2x2x1
jax: 0.10.0
libtpu: 0.0.40
codegen_flags: <defaults>
</compile_context>

<pallas_src>
import functools

import jax
import jax.numpy as jnp
from jax.experimental import pallas as pl
from jax.experimental.pallas import tpu as pltpu


def _round_up(x, m):
    return (x + m - 1) // m * m


def _style_gram_mse_kernel(feat_i_ref, feat_j_ref, target_ref,
                           gram_ref, ploss_ref, acc_ref, *, scale):
    # feat_i_ref : VMEM (tm, tk) f32  -- row block of flattened features
    # feat_j_ref : VMEM (tn, tk) f32  -- col block of flattened features
    # target_ref : VMEM (tm, tn) f32  -- tile of (target gram * weight)
    # gram_ref   : VMEM (tm, tn) f32  -- output: tile of weighted input gram
    # ploss_ref  : VMEM (8, 128) f32  -- output: per-(i,j)-tile SSE (broadcast)
    # acc_ref    : VMEM (tm, tn) f32  -- matmul accumulator scratch
    k = pl.program_id(2)

    @pl.when(k == 0)
    def _():
        acc_ref[...] = jnp.zeros_like(acc_ref)

    # A @ A.T as a trans-B contraction: no transposed copy is materialized.
    acc_ref[...] += jax.lax.dot_general(
        feat_i_ref[...], feat_j_ref[...],
        dimension_numbers=(((1,), (1,)), ((), ())),
        preferred_element_type=jnp.float32)

    @pl.when(k == pl.num_programs(2) - 1)
    def _():
        g = acc_ref[...] * scale            # scale = weight / (a*b*c*d)
        gram_ref[...] = g
        # Fused MSE epilogue: partial sum of squared error for this tile.
        diff = g - target_ref[...]
        sse = jnp.sum(diff * diff)
        ploss_ref[...] = jnp.full((8, 128), sse, dtype=jnp.float32)


def style_loss_forward(x, target_gram_w, weight):
    """Mirrors Style_loss.forward.

    Args:
      x:             (a, b, c, d) float32 input feature map (NCHW).
      target_gram_w: (a*b, a*b) float32, target gram matrix already * weight.
      weight:        python float / scalar style weight.

    Returns:
      (x, gram, loss) -- x unchanged (as in the PyTorch forward), plus the
      weighted gram matrix and the scalar MSE loss that the module stores.
    """
    a, b, c, d = x.shape
    M, K = a * b, c * d

    # --- tile sizes & padding (sublane/lane aligned, VMEM-friendly) ---------
    tm = min(256, _round_up(M, 8))      # gram row tile
    tn = tm                             # gram col tile (symmetric)
    M_pad = _round_up(M, tm)
    tk = min(1024, _round_up(K, 128))   # contraction tile
    K_pad = _round_up(K, tk)
    n_i, n_j, n_k = M_pad // tm, M_pad // tn, K_pad // tk

    feat = x.reshape(M, K).astype(jnp.float32)          # matches .view(a*b, c*d)
    if (M_pad, K_pad) != (M, K):
        feat = jnp.pad(feat, ((0, M_pad - M), (0, K_pad - K)))
    target = target_gram_w.astype(jnp.float32)
    if M_pad != M:
        target = jnp.pad(target, ((0, M_pad - M), (0, M_pad - M)))

    scale = float(weight) / float(M * K)
    kernel = functools.partial(_style_gram_mse_kernel, scale=scale)

    grid_spec = pltpu.PrefetchScalarGridSpec(
        num_scalar_prefetch=0,
        grid=(n_i, n_j, n_k),
        in_specs=[
            pl.BlockSpec((tm, tk), lambda i, j, k: (i, k)),   # feat row block
            pl.BlockSpec((tn, tk), lambda i, j, k: (j, k)),   # feat col block
            pl.BlockSpec((tm, tn), lambda i, j, k: (i, j)),   # target tile
        ],
        out_specs=(
            pl.BlockSpec((tm, tn), lambda i, j, k: (i, j)),   # gram tile
            pl.BlockSpec((8, 128), lambda i, j, k: (i, j)),   # per-tile SSE
        ),
        scratch_shapes=[pltpu.VMEM((tm, tn), jnp.float32)],
    )

    gram_pad, ploss = pl.pallas_call(
        kernel,
        out_shape=(
            jax.ShapeDtypeStruct((M_pad, M_pad), jnp.float32),
            jax.ShapeDtypeStruct((n_i * 8, n_j * 128), jnp.float32),
        ),
        grid_spec=grid_spec,
        compiler_params=pltpu.CompilerParams(
            dimension_semantics=("parallel", "parallel", "arbitrary"),
            vmem_limit_bytes=32 * 1024 * 1024,
        ),
    )(feat, feat, target)

    gram = gram_pad[:M, :M] if M_pad != M else gram_pad
    # Each (8,128) block holds the same per-tile SSE broadcast; pick one per
    # tile (exact, no extra rounding) and normalize by the real element count.
    loss = jnp.sum(ploss[::8, ::128]) / jnp.float32(M * M)
    return x, gram, loss


def _gram_reference(x):
    a, b, c, d = x.shape
    feat = x.reshape(a * b, c * d)
    return (feat @ feat.T) / (a * b * c * d)


if __name__ == "__main__":
    key = jax.random.PRNGKey(0)
    k_in, k_tgt = jax.random.split(key)

    # Small shapes consistent with the module's NCHW conv-feature input.
    a, b, c, d = 2, 4, 16, 16        # batch=2, channels=4, spatial=16x16
    weight = 1000.0                  # typical style weight

    x = jax.random.normal(k_in, (a, b, c, d), dtype=jnp.float32)
    target_feats = jax.random.normal(k_tgt, (a, b, c, d), dtype=jnp.float32)

    # __init__: self.target = gram(target_features).detach() * weight
    target_gram_w = _gram_reference(target_feats) * weight

    out_x, gram, loss = style_loss_forward(x, target_gram_w, weight)
    jax.block_until_ready((out_x, gram, loss))

    # Sanity check against a pure-JAX reference.
    ref_gram = _gram_reference(x) * weight
    ref_loss = jnp.mean((ref_gram - target_gram_w) ** 2)
    assert jnp.allclose(out_x, x)
    assert jnp.allclose(gram, ref_gram, rtol=1e-5, atol=1e-3)
    assert jnp.allclose(loss, ref_loss, rtol=1e-4, atol=1e-2)

    print("KERNEL_OK")
</pallas_src>

<mosaic_0001>
module attributes {stable_mosaic.version = 11 : i64} {
  func.func @_style_gram_mse_kernel(%arg0: i32, %arg1: i32, %arg2: i32, %arg3: memref<8x256xf32, #tpu.memory_space<vmem>>, %arg4: memref<8x256xf32, #tpu.memory_space<vmem>>, %arg5: memref<8x8xf32, #tpu.memory_space<vmem>>, %arg6: memref<8x8xf32, #tpu.memory_space<vmem>>, %arg7: memref<8x128xf32, #tpu.memory_space<vmem>>, %arg8: memref<8x8xf32, #tpu.memory_space<vmem>>) attributes {dimension_semantics = [#tpu.dimension_semantics<parallel>, #tpu.dimension_semantics<parallel>, #tpu.dimension_semantics<arbitrary>], iteration_bounds = array<i64: 1, 1, 1>, scalar_prefetch = 0 : i64, scratch_operands = 1 : i64, tpu.core_type = #tpu.core_type<tc>, window_params = [{transform_indices = @transform_0, window_bounds = array<i64: 8, 256>}, {transform_indices = @transform_1, window_bounds = array<i64: 8, 256>}, {transform_indices = @transform_2, window_bounds = array<i64: 8, 8>}, {transform_indices = @transform_3, window_bounds = array<i64: 8, 8>}, {transform_indices = @transform_4, window_bounds = array<i64: 8, 128>}]} {
    %c0_i32 = arith.constant 0 : i32
    %0 = arith.cmpi eq, %arg2, %c0_i32 : i32
    %1 = arith.extui %0 : i1 to i32
    %c0_i32_0 = arith.constant 0 : i32
    %2 = arith.cmpi ne, %1, %c0_i32_0 : i32
    scf.if %2 {
      %cst_10 = arith.constant 0.000000e+00 : f32
      %12 = vector.broadcast %cst_10 : f32 to vector<8x8xf32>
      %c0_11 = arith.constant 0 : index
      %c0_12 = arith.constant 0 : index
      %13 = vector.load %arg8[%c0_11, %c0_12] : memref<8x8xf32, #tpu.memory_space<vmem>>, vector<8x8xf32>
      tpu.vector_store %arg8[%c0_11, %c0_12], %12 {strides = array<i32>} : memref<8x8xf32, #tpu.memory_space<vmem>>, vector<8x8xf32>,
    } else {
    }
    %c0 = arith.constant 0 : index
    %c0_1 = arith.constant 0 : index
    %3 = vector.load %arg8[%c0, %c0_1] : memref<8x8xf32, #tpu.memory_space<vmem>>, vector<8x8xf32>
    %c0_2 = arith.constant 0 : index
    %c0_3 = arith.constant 0 : index
    %4 = vector.load %arg3[%c0_2, %c0_3] : memref<8x256xf32, #tpu.memory_space<vmem>>, vector<8x256xf32>
    %c0_4 = arith.constant 0 : index
    %c0_5 = arith.constant 0 : index
    %5 = vector.load %arg4[%c0_4, %c0_5] : memref<8x256xf32, #tpu.memory_space<vmem>>, vector<8x256xf32>
    %cst = arith.constant dense<0.000000e+00> : vector<8x8xf32>
    %6 = tpu.matmul %4, %5, %cst {dimension_numbers = #tpu.dot_dimension_numbers<[1], [1], [0], [0], [0, 0, 1, 0], [], []>} : vector<8x256xf32>, vector<8x256xf32>, vector<8x8xf32> -> vector<8x8xf32>
    %7 = arith.addf %3, %6 : vector<8x8xf32>
    %c0_6 = arith.constant 0 : index
    %c0_7 = arith.constant 0 : index
    %8 = vector.load %arg8[%c0_6, %c0_7] : memref<8x8xf32, #tpu.memory_space<vmem>>, vector<8x8xf32>
    tpu.vector_store %arg8[%c0_6, %c0_7], %7 {strides = array<i32>} : memref<8x8xf32, #tpu.memory_space<vmem>>, vector<8x8xf32>,
    %c0_i32_8 = arith.constant 0 : i32
    %9 = arith.cmpi eq, %arg2, %c0_i32_8 : i32
    %10 = arith.extui %9 : i1 to i32
    %c0_i32_9 = arith.constant 0 : i32
    %11 = arith.cmpi ne, %10, %c0_i32_9 : i32
    scf.if %11 {
      %c0_10 = arith.constant 0 : index
      %c0_11 = arith.constant 0 : index
      %12 = vector.load %arg8[%c0_10, %c0_11] : memref<8x8xf32, #tpu.memory_space<vmem>>, vector<8x8xf32>
      %cst_12 = arith.constant 0.48828125 : f32
      %13 = vector.broadcast %cst_12 : f32 to vector<8x8xf32>
      %14 = arith.mulf %12, %13 : vector<8x8xf32>
      %c0_13 = arith.constant 0 : index
      %c0_14 = arith.constant 0 : index
      %15 = vector.load %arg6[%c0_13, %c0_14] : memref<8x8xf32, #tpu.memory_space<vmem>>, vector<8x8xf32>
      tpu.vector_store %arg6[%c0_13, %c0_14], %14 {strides = array<i32>} : memref<8x8xf32, #tpu.memory_space<vmem>>, vector<8x8xf32>,
      %c0_15 = arith.constant 0 : index
      %c0_16 = arith.constant 0 : index
      %16 = vector.load %arg5[%c0_15, %c0_16] : memref<8x8xf32, #tpu.memory_space<vmem>>, vector<8x8xf32>
      %17 = arith.subf %14, %16 : vector<8x8xf32>
      %18 = arith.mulf %17, %17 : vector<8x8xf32>
      %19 = vector.shape_cast %18 : vector<8x8xf32> to vector<1x8x8xf32>
      %cst_17 = arith.constant dense<0.000000e+00> : vector<1xf32>
      %20 = vector.multi_reduction <add>, %19, %cst_17 [1, 2] : vector<1x8x8xf32> to vector<1xf32>
      %21 = vector.shape_cast %20 : vector<1xf32> to vector<1x1x1xf32>
      %22 = vector.extract %21[0, 0, 0] : f32 from vector<1x1x1xf32>
      %23 = vector.broadcast %22 : f32 to vector<8x128xf32>
      %c0_18 = arith.constant 0 : index
      %c0_19 = arith.constant 0 : index
      %24 = vector.load %arg7[%c0_18, %c0_19] : memref<8x128xf32, #tpu.memory_space<vmem>>, vector<8x128xf32>
      tpu.vector_store %arg7[%c0_18, %c0_19], %23 {strides = array<i32>} : memref<8x128xf32, #tpu.memory_space<vmem>>, vector<8x128xf32>,
    } else {
    }
    return
  }
  func.func @transform_0(%arg0: i32, %arg1: i32, %arg2: i32) -> (i32, i32) {
    %c0_i32 = arith.constant 0 : i32
    return %arg0, %arg2 : i32, i32
  }
  func.func @transform_1(%arg0: i32, %arg1: i32, %arg2: i32) -> (i32, i32) {
    %c0_i32 = arith.constant 0 : i32
    return %arg1, %arg2 : i32, i32
  }
  func.func @transform_2(%arg0: i32, %arg1: i32, %arg2: i32) -> (i32, i32) {
    %c0_i32 = arith.constant 0 : i32
    return %arg0, %arg1 : i32, i32
  }
  func.func @transform_3(%arg0: i32, %arg1: i32, %arg2: i32) -> (i32, i32) {
    %c0_i32 = arith.constant 0 : i32
    return %arg0, %arg1 : i32, i32
  }
  func.func @transform_4(%arg0: i32, %arg1: i32, %arg2: i32) -> (i32, i32) {
    %c0_i32 = arith.constant 0 : i32
    return %arg0, %arg1 : i32, i32
  }
}

</mosaic_0001>

<bundles_post_ra>
// kernel: tpu_custom_call.1
= control target key start
LH: loop header
LB: loop body
LE: loop exit
PB: predicated region body
PF: predicated region fallthrough
CT: control target
= control target key end

     0   :  { %10 = vsyncpa [#allocation4], 0  ;;  %s409_s0 = inlined_call_operand.hbm [shape: f32[8,256], index: 0, kind: input, shape index: {}]   ;;  %s410_s1 = inlined_call_operand.hbm [shape: f32[8,256], index: 1, kind: input, shape index: {}]   ;;  %s411_s2 = inlined_call_operand.hbm [shape: f32[8,8], index: 2, kind: input, shape index: {}]   ;;  %s412_s3 = inlined_call_operand.hbm [shape: f32[8,8], index: 3, kind: output, shape index: {0}]   ;;  %s413_s4 = inlined_call_operand.hbm [shape: f32[8,128], index: 4, kind: output, shape index: {1}]  }
   0x1   :  { %11 = vsyncpa [#allocation7], 0 }
   0x2   :  { %12 = vsyncpa [#allocation5], 0 }
   0x3   :  { %13 = vsyncpa [#allocation11], 0  ;;  %s314_s15 = smov [#allocation6]   ;;  %s315_s17 = smov [#allocation3]  }
   0x4   :  { %s30_s16 = sshll.u32 %s314_s15, 4  ;;  %s20_s18 = sshll.u32 %s315_s17, 4  ;;  %s31_s16 = int_to_ptr.vmem [resolvable:$true] %s30_s16  ;;  %s21_s18 = int_to_ptr.vmem [resolvable:$true] %s20_s18 }
   0x5   :  { %s196_s21 = scalar_lea.hbm %s410_s1, 256 }
   0x6   :  { %p197_p0 = scmp.ne.s32.totalorder %s410_s1, %s196_s21  ;;  %p200_p1 = scmp.lt.u32.totalorder %s196_s21, %s410_s1 }
   0x8   :  { %p202_p2 = pnand %p200_p1, %p197_p0 }
   0xa   :  { %205 = shalt.err (!%p202_p2)
}
   0xb   :  { %s206_s26 = scalar_lea.vmem %s31_s16, 256  ;;  %p211_p4 = scmp.lt.s32.totalorder %s31_s16, %s31_s16 }
   0xc   :  { %p207_p3 = scmp.ne.s32.totalorder %s31_s16, %s206_s26  ;;  %p212_p5 = scmp.lt.s32.totalorder %s206_s26, %s206_s26 }
   0xe   :  { %p213_p6 = por %p212_p5, %p211_p4 }
  0x10   :  { %p214_p7 = pnand %p213_p6, %p207_p3 }
  0x12   :  { %217 = shalt.err (!%p214_p7)
}
  0x13   :  { %33 = dma.hbm_to_vmem [thread:$0]  %s410_s1, 256, %s31_s16, [#allocation7]  }
  0x14   :  { %s218_s5 = scalar_lea.hbm %s409_s0, 256 }
  0x15   :  { %p219_p8 = scmp.ne.s32.totalorder %s409_s0, %s218_s5  ;;  %p222_p9 = scmp.lt.u32.totalorder %s218_s5, %s409_s0 }
  0x17   :  { %p224_p10 = pnand %p222_p9, %p219_p8 }
  0x19   :  { %227 = shalt.err (!%p224_p10)
}
  0x1a   :  { %s228_s10 = scalar_lea.vmem %s21_s18, 256  ;;  %p233_p12 = scmp.lt.s32.totalorder %s21_s18, %s21_s18 }
  0x1b   :  { %p229_p11 = scmp.ne.s32.totalorder %s21_s18, %s228_s10  ;;  %p234_p13 = scmp.lt.s32.totalorder %s228_s10, %s228_s10 }
  0x1d   :  { %p235_p0 = por %p234_p13, %p233_p12 }
  0x1f   :  { %p236_p1 = pnand %p235_p0, %p229_p11 }
  0x21   :  { %239 = shalt.err (!%p236_p1)
}
  0x22   :  { %23 = dma.hbm_to_vmem [thread:$0]  %s409_s0, 256, %s21_s18, [#allocation4]  }
  0x23   :  { %s316_s12 = smov [#allocation8]   ;;  %s240_s16 = scalar_lea.hbm %s411_s2, 128 }
  0x24   :  { %s40_s13 = sshll.u32 %s316_s12, 4  ;;  %p241_p2 = scmp.ne.s32.totalorder %s411_s2, %s240_s16  ;;  %s41_s13 = int_to_ptr.vmem [resolvable:$true] %s40_s13 }
  0x25   :  { %p244_p3 = scmp.lt.u32.totalorder %s240_s16, %s411_s2 }
  0x27   :  { %p246_p4 = pnand %p244_p3, %p241_p2 }
  0x29   :  { %249 = shalt.err (!%p246_p4)
}
  0x2a   :  { %s250_s22 = scalar_lea.vmem %s41_s13, 128  ;;  %p255_p6 = scmp.lt.s32.totalorder %s41_s13, %s41_s13 }
  0x2b   :  { %p251_p5 = scmp.ne.s32.totalorder %s41_s13, %s250_s22  ;;  %p256_p7 = scmp.lt.s32.totalorder %s250_s22, %s250_s22 }
  0x2d   :  { %p257_p8 = por %p256_p7, %p255_p6 }
  0x2f   :  { %p258_p9 = pnand %p257_p8, %p251_p5 }
  0x31   :  { %261 = shalt.err (!%p258_p9)
}
  0x32   :  { %43 = dma.hbm_to_vmem [thread:$0]  %s411_s2, 128, %s41_s13, [#allocation7]  }
  0x33   :  { %306 = dma.done.wait [#allocation4], 256  }
  0x34   :  { %307 = vsyncadd [#allocation4], 4294967040 }
  0x35   :  { %308 = dma.done.wait [#allocation7], 384  }
  0x36   :  { %309 = vsyncadd [#allocation7], 4294966912  ;;  %vm57_vm0 = vcmask 64512   ;;  %v317_v0 = vmov 0.0   ;;  %v63_v1 = vld [vmem:[#allocation6 + $0x8] sm:$0xff]  ;;  %v62_v2 = vld [vmem:[#allocation6] sm:$0xff] }
  0x37   :  { %58 = vst.msk [vmem:[#allocation2] sm:$0xff] %vm57_vm0, %v317_v0  ;;  %v61_v3 = vld [vmem:[#allocation3 + $0x8] sm:$0xff]  ;;  %64 = vmatprep.subr.mxu0 %v63_v1  ;;  %v60_v4 = vld [vmem:[#allocation3] sm:$0xff]  ;;  %s318_s2 = smov [#allocation9]  }
  0x38   :  { %128 = vmatprep.mubr.f32.mxu0 %v61_v3  ;;  %65 = vmatpush1.xpose.msra.mxu0 %v62_v2  ;;  %v143_v10 = vld [vmem:[#allocation8] sm:$0xff]  ;;  %s164_s23 = sshll.u32 %s318_s2, 4  ;;  %s165_s23 = int_to_ptr.vmem [resolvable:$true] %s164_s23 }
  0x39   :  { %s262_s24 = scalar_lea.vmem %s165_s23, 128  ;;  %p267_p11 = scmp.lt.s32.totalorder %s165_s23, %s165_s23 }
  0x3a   :  { %p263_p10 = scmp.ne.s32.totalorder %s165_s23, %s262_s24  ;;  %p268_p12 = scmp.lt.s32.totalorder %s262_s24, %s262_s24 }
  0x3b   :  { %129 = vmatmul.mubr.f32.vlgmr.msra.gmra.mrb[0].mxu0 %v60_v4 }
  0x3c   :  { %p269_p13 = por %p268_p12, %p267_p11 }
  0x3e   :  { %v59_v5 = vld [vmem:[#allocation2] sm:$0xff]  ;;  %p270_p0 = pnand %p269_p13, %p263_p10 }
 0x10e   :  { %v130_v6 = vpop.f32.mrb[0].mxu0 }
 0x10f   :  { %v134_v7 = vadd.f32 %v130_v6, %v59_v5  ;;  %v132_v8 = vpop.f32.mrb[1].mxu0 }
 0x111   :  { %136 = vst.msk [vmem:[#allocation2] sm:$0xff] %vm57_vm0, %v134_v7 }
 0x118   :  { %v140_v9 = vld [vmem:[#allocation2] sm:$0xff] }
 0x119   :  { %v141_v11 = vmul.f32 0.48828125, %v140_v9 }
 0x11b   :  { %v144_v12 = vsub.f32 %v141_v11, %v143_v10  ;;  %142 = vst.msk [vmem:[#allocation9] sm:$0xff] %vm57_vm0, %v141_v11 }
 0x11d   :  { %v145_v13 = vmul.f32 %v144_v12, %v144_v12 }
 0x11f   :  { %v146_v14 = vsel %vm57_vm0, %v145_v13, 0.0 }
 0x120   :  { %147 = vadd.xlane.f32.xlu0 %v146_v14 }
 0x121   :  { %273 = shalt.err (!%p270_p0)
}
 0x122   :  { %s274_s27 = scalar_lea.hbm %s412_s3, 128 }
 0x123   :  { %p275_p1 = scmp.ne.s32.totalorder %s412_s3, %s274_s27  ;;  %p278_p2 = scmp.lt.u32.totalorder %s274_s27, %s412_s3 }
 0x125   :  { %p280_p3 = pnand %p278_p2, %p275_p1 }
 0x127   :  { %283 = shalt.err (!%p280_p3)
}
 0x128   :  { %167 = dma.vmem_to_hbm [thread:$0]  %s165_s23, 128, %s412_s3, [#allocation5]  }
 0x129   :  { %s319_s8 = smov [#allocation10]  }
 0x12a   :  { %s174_s9 = sshll.u32 %s319_s8, 4  ;;  %s175_s9 = int_to_ptr.vmem [resolvable:$true] %s174_s9 }
 0x12b   :  { %s284_s1 = scalar_lea.vmem %s175_s9, 128  ;;  %p289_p5 = scmp.lt.s32.totalorder %s175_s9, %s175_s9 }
 0x12c   :  { %p285_p4 = scmp.ne.s32.totalorder %s175_s9, %s284_s1  ;;  %p290_p6 = scmp.lt.s32.totalorder %s284_s1, %s284_s1 }
 0x12e   :  { %p291_p7 = por %p290_p6, %p289_p5 }
 0x130   :  { %p292_p8 = pnand %p291_p7, %p285_p4 }
 0x1ad   :  { %v148_v15 = vpop.xlane.xlu0 %147 }
 0x1ae   :  { %v149_v16 = vrot.slane %v148_v15, 4 }
 0x1b0   :  { %v150_v17 = vadd.f32 %v149_v16, %v148_v15 }
 0x1b2   :  { %v151_v18 = vrot.slane %v150_v17, 2 }
 0x1b4   :  { %v152_v19 = vadd.f32 %v151_v18, %v150_v17 }
 0x1b6   :  { %v153_v20 = vrot.slane %v152_v19, 1 }
 0x1b8   :  { %v154_v21 = vadd.f32 %v153_v20, %v152_v19 }
 0x1ba   :  { %188 = vpush %v154_v21 }
 0x1eb   :  { %s189_s10 = spop %188 }
 0x1ec   :  { %v156_v22 = vstv %s189_s10 }
 0x1ed   :  { %157 = vst [vmem:[#allocation10] sm:$0xff] %v156_v22 }
 0x1ee   :  { %295 = shalt.err (!%p292_p8)
}
 0x1ef   :  { %s296_s12 = scalar_lea.hbm %s413_s4, 128 }
 0x1f0   :  { %p297_p9 = scmp.ne.s32.totalorder %s413_s4, %s296_s12  ;;  %p300_p10 = scmp.lt.u32.totalorder %s296_s12, %s413_s4 }
 0x1f2   :  { %p302_p11 = pnand %p300_p10, %p297_p9 }
 0x1f4   :  { %305 = shalt.err (!%p302_p11)
}
 0x1f5   :  { %177 = dma.vmem_to_hbm [thread:$0]  %s175_s9, 128, %s413_s4, [#allocation11]  }
 0x1f6   :  { %310 = dma.done.wait [#allocation5], 128  }
 0x1f7   :  { %311 = vsyncadd [#allocation5], 4294967168 }
 0x1f8   :  { %312 = dma.done.wait [#allocation11], 128  }
 0x1f9   :  { %313 = vsyncadd [#allocation11], 4294967168 }
 0x1fa   :  { %184 = vsyncpa [#allocation4], 1 }
 0x1fb   :  { %185 = vsyncpa [#allocation7], 1 }
 0x1fc   :  { %186 = vsyncpa [#allocation5], 1 }
 0x1fd   :  { %187 = vsyncpa [#allocation11], 1 }

</bundles_post_ra>
